<compile_context>
chip_gen: v6e
topology: v6e:2x2x1
jax: 0.10.0
libtpu: 0.0.40
codegen_flags: <defaults>
</compile_context>

<pallas_src>
import functools
import math

import jax
import jax.numpy as jnp
from jax import lax
from jax.experimental import pallas as pl
from jax.experimental.pallas import tpu as pltpu


# ----------------------------------------------------------------------------
# helpers
# ----------------------------------------------------------------------------
def _pick_tile(n, candidates):
    """Largest candidate that divides n, else n itself (full extent)."""
    for c in candidates:
        if n % c == 0:
            return c
    return n


def _sigmoid(v):
    return 1.0 / (1.0 + jnp.exp(-v))


def _softplus(v):
    return jnp.maximum(v, 0.0) + jnp.log(1.0 + jnp.exp(-jnp.abs(v)))


def _vmem_limit_bytes():
    # v7x has only 64 MiB physical VMEM: keep the scoped limit <= 40 MiB and
    # derive it from the chip when the query is available (review item).
    try:
        cap = int(pltpu.get_tpu_info().vmem_capacity_bytes)
    except Exception:  # older/newer jax, or tracing off-TPU
        cap = 128 * 1024 * 1024
    return int(min(40 * 1024 * 1024, (cap * 5) // 8))


# ----------------------------------------------------------------------------
# Kernel 1: linear_proj (3 chained Linear layers) + DyTanh(d_out)
#           grid over row tiles of the flattened (B*L, in_dim) token matrix.
# ----------------------------------------------------------------------------
def _proj_dyt_kernel(x_ref, w1_ref, b1_ref, w2_ref, b2_ref, w3_ref, b3_ref,
                     alpha_ref, dw_ref, db_ref, o_ref):
    x = x_ref[...]                                               # (TM, in_dim)
    h = jnp.dot(x.astype(jnp.bfloat16), w1_ref[...],
                preferred_element_type=jnp.float32) + b1_ref[...]
    h = jnp.dot(h.astype(jnp.bfloat16), w2_ref[...],
                preferred_element_type=jnp.float32) + b2_ref[...]
    h = jnp.dot(h.astype(jnp.bfloat16), w3_ref[...],
                preferred_element_type=jnp.float32) + b3_ref[...]
    y = dw_ref[...] * jnp.tanh(alpha_ref[...] * h) + db_ref[...]
    o_ref[...] = y.astype(o_ref.dtype)                           # bf16 epilogue


def proj_dyt(x, p, *, out_dtype=jnp.bfloat16):
    B, L, c_in = x.shape
    dim2 = p["w2"].shape[1]
    d_out = p["w3"].shape[1]
    n = B * L
    # Cap tm so the (tm, dim2) f32 intermediate stays modest (review item).
    cap = max(8, min(512, (2 * 1024 * 1024) // max(4 * dim2, 1)))
    cands = tuple(c for c in (512, 256, 128, 64, 32, 16, 8) if c <= cap)
    tm = _pick_tile(n, cands or (8,))

    names = ("w1", "b1", "w2", "b2", "w3", "b3", "alpha", "dyt_w", "dyt_b")
    args = [p[k] for k in names]

    def _const_spec(shape):
        nd = len(shape)
        # Constant-index weights: single-buffered (halves their VMEM residency).
        return pl.BlockSpec(shape, lambda i, _nd=nd: (0,) * _nd,
                            pipeline_mode=pl.Buffered(1))

    out = pl.pallas_call(
        _proj_dyt_kernel,
        out_shape=jax.ShapeDtypeStruct((n, d_out), out_dtype),
        grid=(n // tm,),
        in_specs=[pl.BlockSpec((tm, c_in), lambda i: (i, 0))]
                 + [_const_spec(a.shape) for a in args],
        out_specs=pl.BlockSpec((tm, d_out), lambda i: (i, 0)),
        compiler_params=pltpu.CompilerParams(
            dimension_semantics=("parallel",),
            vmem_limit_bytes=_vmem_limit_bytes()),
    )(x.reshape(n, c_in), *args)
    return out.reshape(B, L, d_out)


# ----------------------------------------------------------------------------
# Kernel 2: MambaLayer = x + S6-Mamba(LayerNorm(x))  [+ optional fused DyTanh]
#           grid = (batch, L-chunk); h / conv carry live in scratch.
# ----------------------------------------------------------------------------
def _mamba_kernel(*refs, d_inner, d_state, d_conv, chunk, apply_dyt):
    if apply_dyt:
        (x_ref, lnw_ref, lnb_ref, inw_ref, convw_ref, convb_ref, wbc_ref,
         wdtl_ref, dtw_ref, dtb_ref, aneg_ref, dskip_ref, outw_ref,
         dyta_ref, dytw_ref, dytb_ref, o_ref,
         h_s, xprev_s, dt_s, dtxc_s, y_s, bT_s, cT_s) = refs
    else:
        (x_ref, lnw_ref, lnb_ref, inw_ref, convw_ref, convb_ref, wbc_ref,
         wdtl_ref, dtw_ref, dtb_ref, aneg_ref, dskip_ref, outw_ref, o_ref,
         h_s, xprev_s, dt_s, dtxc_s, y_s, bT_s, cT_s) = refs
        dyta_ref = dytw_ref = dytb_ref = None

    Lc = x_ref.shape[1]
    pad = d_conv - 1

    # Reset carried state (SSM state + conv carry) at the first chunk of a batch.
    @pl.when(pl.program_id(1) == 0)
    def _():
        h_s[...] = jnp.zeros_like(h_s)
        xprev_s[...] = jnp.zeros_like(xprev_s)

    x = x_ref[0].astype(jnp.float32)                             # (Lc, D)

    # --- LayerNorm over feature dim (eps = 1e-5) ---
    mu = jnp.mean(x, axis=-1, keepdims=True)
    var = jnp.mean((x - mu) ** 2, axis=-1, keepdims=True)
    xn = (x - mu) * lax.rsqrt(var + 1e-5) * lnw_ref[...] + lnb_ref[...]

    # --- fused in_proj [x | z] (bias-free) ---
    xz = jnp.dot(xn.astype(jnp.bfloat16), inw_ref[...],
                 preferred_element_type=jnp.float32)             # (Lc, 2*d_inner)
    xin = xz[:, :d_inner]
    z = xz[:, d_inner:]

    # --- causal depthwise Conv1d: d_conv shifted MACs via pltpu.roll (XLU)
    #     plus a row mask that injects the previous chunk's tail (no padded
    #     scratch round-trip, no misaligned sublane loads). ---
    convw = convw_ref[...]                                       # (d_conv, d_inner)
    conv = convw[pad:pad + 1, :] * xin                           # k = d_conv-1, shift 0
    if pad > 0:
        xprev = xprev_s[...]                                     # previous chunk's xin
        row = lax.broadcasted_iota(jnp.int32, (Lc, d_inner), 0)
        for k in range(pad):                                     # shifts pad..1
            s = pad - k
            cur = pltpu.roll(xin, shift=s, axis=0)               # rows [s:) = xin[:-s]
            prev = pltpu.roll(xprev, shift=s, axis=0)            # rows [:s) = prev tail
            conv = conv + convw[k:k + 1, :] * jnp.where(row < s, prev, cur)
        xprev_s[...] = xin                                       # carry for next chunk
    conv = conv + convb_ref[...]
    xc = conv * _sigmoid(conv)                                   # SiLU

    # --- x_proj: B/C produced already transposed (d_state, Lc) on the MXU,
    #     dt through the low-rank dt path; no misaligned lane slicing. ---
    xcT = jnp.transpose(xc).astype(jnp.bfloat16)                 # (d_inner, Lc)
    bcT = jnp.dot(wbc_ref[...], xcT,
                  preferred_element_type=jnp.float32)            # (2*d_state, Lc)
    bT_s[...] = bcT[:d_state, :]
    cT_s[...] = bcT[d_state:, :]
    dt_low = jnp.dot(xc.astype(jnp.bfloat16), wdtl_ref[...],
                     preferred_element_type=jnp.float32)         # (Lc, dt_rank)
    dt = jnp.dot(dt_low, dtw_ref[...],
                 preferred_element_type=jnp.float32) + dtb_ref[...]
    dt = _softplus(dt)                                           # (Lc, d_inner)
    dt_s[...] = dt
    dtxc_s[...] = dt * xc

    a_neg = aneg_ref[...]                                        # -exp(A_log), hoisted

    # --- selective scan: state (d_state, d_inner), d_inner on the lane axis ---
    n_sub = Lc // chunk

    def sub_body(si, h):
        off = pl.multiple_of(si * chunk, chunk)
        dt_c = dt_s[pl.ds(off, chunk), :]                        # (chunk, d_inner)
        du_c = dtxc_s[pl.ds(off, chunk), :]                      # (chunk, d_inner)
        bT_c = bT_s[:, pl.ds(off, chunk)]                        # (d_state, chunk)
        cT_c = cT_s[:, pl.ds(off, chunk)]                        # (d_state, chunk)
        # All `chunk` exps are independent of h -> emitted before the serial
        # recurrence so the EUP overlaps with the VPU h-updates.
        dAs = [jnp.exp(dt_c[u:u + 1, :] * a_neg) for u in range(chunk)]
        rows = []
        for u in range(chunk):                                   # short static unroll
            h = dAs[u] * h + bT_c[:, u:u + 1] * du_c[u:u + 1, :]
            rows.append(jnp.sum(cT_c[:, u:u + 1] * h, axis=0, keepdims=True))
        y_s[pl.ds(off, chunk), :] = jnp.concatenate(rows, axis=0)
        return h

    h_s[...] = lax.fori_loop(0, n_sub, sub_body, h_s[...])       # carry across chunks

    # --- D-skip, gate with SiLU(z), out_proj, residual (+ optional DyTanh) ---
    y = y_s[...] + xc * dskip_ref[...]
    y = y * (z * _sigmoid(z))
    out = jnp.dot(y.astype(jnp.bfloat16), outw_ref[...],
                  preferred_element_type=jnp.float32)            # (Lc, D)
    res = x + out
    if apply_dyt:
        off_l = pl.multiple_of(pl.program_id(1) * Lc, Lc)
        dw = dytw_ref[pl.ds(off_l, Lc), :]                       # resident (L, D) weights
        db = dytb_ref[pl.ds(off_l, Lc), :]
        res = dw * jnp.tanh(dyta_ref[...] * res) + db
    o_ref[0] = res.astype(o_ref.dtype)


def mamba_layer(x, p, *, d_conv, dyt=None, out_dtype=jnp.float32):
    B, L, D = x.shape
    d_state, d_inner = p["a_neg"].shape
    # L-chunk: prefer large MXU-filling tiles (256 for v6e/v7x) bounded by a
    # VMEM scratch budget for the L-resident f32 buffers.
    budget = 6 * 1024 * 1024
    cands = tuple(c for c in (256, 128, 64, 32, 16, 8)
                  if 6 * c * d_inner * 4 <= budget)
    Lc = _pick_tile(L, cands or (8,))
    pad = max(d_conv - 1, 0)
    assert Lc >= pad, "L-chunk must cover the causal-conv receptive tail"
    chunk = 8 if Lc % 8 == 0 else _pick_tile(Lc, (4, 2, 1))      # sublane-aligned scan
    apply_dyt = dyt is not None

    names = ("ln_w", "ln_b", "in_w", "conv_w", "conv_b", "wbc_t",
             "w_dtlow", "dt_w", "dt_b", "a_neg", "d_skip", "out_w")
    args = [p[k] for k in names]

    def _const_spec(shape):
        nd = len(shape)
        # Constant-index params: single-buffered copy kept resident in VMEM.
        return pl.BlockSpec(shape, lambda b, l, _nd=nd: (0,) * _nd,
                            pipeline_mode=pl.Buffered(1))

    in_specs = ([pl.BlockSpec((1, Lc, D), lambda b, l: (b, l, 0))]
                + [_const_spec(a.shape) for a in args])
    if apply_dyt:
        args = args + [dyt["alpha"], dyt["w"], dyt["b"]]
        in_specs += [_const_spec(dyt["alpha"].shape),
                     _const_spec(dyt["w"].shape),       # (L, D) kept resident,
                     _const_spec(dyt["b"].shape)]       # sliced in-kernel per chunk

    kernel = functools.partial(
        _mamba_kernel, d_inner=d_inner, d_state=d_state, d_conv=d_conv,
        chunk=chunk, apply_dyt=apply_dyt)

    return pl.pallas_call(
        kernel,
        out_shape=jax.ShapeDtypeStruct((B, L, D), out_dtype),
        grid=(B, L // Lc),
        in_specs=in_specs,
        out_specs=pl.BlockSpec((1, Lc, D), lambda b, l: (b, l, 0)),
        scratch_shapes=[
            pltpu.VMEM((d_state, d_inner), jnp.float32),  # carried SSM state h
            pltpu.VMEM((Lc, d_inner), jnp.float32),       # previous chunk's conv input
            pltpu.VMEM((Lc, d_inner), jnp.float32),       # dt
            pltpu.VMEM((Lc, d_inner), jnp.float32),       # dt * u
            pltpu.VMEM((Lc, d_inner), jnp.float32),       # scan output y
            pltpu.VMEM((d_state, Lc), jnp.float32),       # B(t)^T
            pltpu.VMEM((d_state, Lc), jnp.float32),       # C(t)^T
        ],
        compiler_params=pltpu.CompilerParams(
            dimension_semantics=("parallel", "arbitrary"),
            vmem_limit_bytes=_vmem_limit_bytes()),
    )(x, *args)


# ----------------------------------------------------------------------------
# Deterministic parameter construction (mirrors MambaEncoder.__init__ shapes)
# ----------------------------------------------------------------------------
def init_proj_params(key, in_dim, d_out):
    dim1, dim2 = in_dim * 2, in_dim * 4
    k1, k2, k3 = jax.random.split(key, 3)
    rnd = lambda k, shp: (0.001 * jax.random.normal(k, shp, jnp.float32)
                          ).astype(jnp.bfloat16)
    return dict(
        w1=rnd(k1, (in_dim, dim1)), b1=jnp.zeros((1, dim1), jnp.float32),
        w2=rnd(k2, (dim1, dim2)), b2=jnp.zeros((1, dim2), jnp.float32),
        w3=rnd(k3, (dim2, d_out)), b3=jnp.zeros((1, d_out), jnp.float32),
        alpha=jnp.full((1, 1), 0.5, jnp.float32),
        dyt_w=jnp.ones((1, d_out), jnp.float32),
        dyt_b=jnp.zeros((1, d_out), jnp.float32),
    )


def init_mamba_params(key, d_model, d_state, d_conv):
    d_inner = 2 * d_model
    dt_rank = max(1, math.ceil(d_model / 16))
    ks = jax.random.split(key, 8)
    rnd = lambda k, shape, s=0.02: s * jax.random.normal(k, shape, jnp.float32)
    # fused in_proj: [x | z]
    in_w = jnp.concatenate([rnd(ks[0], (d_model, d_inner)),
                            rnd(ks[1], (d_model, d_inner))], axis=1)
    # x_proj for B and C, stored pre-transposed: (2*d_state, d_inner)
    wbc_t = jnp.concatenate([rnd(ks[4], (d_state, d_inner)),
                             rnd(ks[5], (d_state, d_inner))], axis=0)
    # A = -exp(A_log) hoisted out of the kernel (A_log = log(1..d_state)).
    a = jnp.broadcast_to(jnp.arange(1, d_state + 1, dtype=jnp.float32)[:, None],
                         (d_state, d_inner))
    return dict(
        ln_w=jnp.ones((1, d_model), jnp.float32),
        ln_b=jnp.zeros((1, d_model), jnp.float32),
        in_w=in_w.astype(jnp.bfloat16),
        conv_w=rnd(ks[2], (d_conv, d_inner), 0.1),
        conv_b=jnp.zeros((1, d_inner), jnp.float32),
        wbc_t=wbc_t.astype(jnp.bfloat16),
        w_dtlow=rnd(ks[3], (d_inner, dt_rank)).astype(jnp.bfloat16),
        dt_w=rnd(ks[6], (dt_rank, d_inner), 0.1),
        dt_b=jnp.full((1, d_inner), 0.01, jnp.float32),
        a_neg=-a,
        d_skip=jnp.ones((1, d_inner), jnp.float32),
        out_w=rnd(ks[7], (d_inner, d_model)).astype(jnp.bfloat16),
    )


def init_params(key, seq_len, in_dim, d_out, d_state, d_conv):
    k0, k1, k2 = jax.random.split(key, 3)
    return dict(
        proj=init_proj_params(k0, in_dim, d_out),
        mamba1=init_mamba_params(k1, d_out, d_state, d_conv),
        mamba2=init_mamba_params(k2, d_out, d_state, d_conv),
        dyt2=dict(
            alpha=jnp.full((1, 1), 0.5, jnp.float32),
            w=jnp.ones((seq_len, d_out), jnp.float32),
            b=jnp.zeros((seq_len, d_out), jnp.float32),
        ),
    )


def mamba_encoder_forward(x, params, *, d_state, d_conv):
    assert params["mamba1"]["a_neg"].shape[0] == d_state
    # bf16 inter-kernel intermediates (halves HBM traffic between pallas_calls).
    h = proj_dyt(x, params["proj"], out_dtype=jnp.bfloat16)
    h = mamba_layer(h, params["mamba1"], d_conv=d_conv, out_dtype=jnp.bfloat16)
    # final DyTanh((seq_len, d_out)) fused into the second MambaLayer epilogue
    h = mamba_layer(h, params["mamba2"], d_conv=d_conv, dyt=params["dyt2"],
                    out_dtype=jnp.float32)
    return h


# ----------------------------------------------------------------------------
if __name__ == "__main__":
    B, seq_len, in_dim = 2, 8, 4
    d_out, d_state, d_conv = 8, 32, 4

    key = jax.random.PRNGKey(0)
    kx, kp = jax.random.split(key)
    x = jax.random.normal(kx, (B, seq_len, in_dim), jnp.float32)
    params = init_params(kp, seq_len, in_dim, d_out, d_state, d_conv)

    out = mamba_encoder_forward(x, params, d_state=d_state, d_conv=d_conv)
    out = jax.block_until_ready(out)

    assert out.shape == (B, seq_len, d_out), out.shape
    assert bool(jnp.all(jnp.isfinite(out)))
    print("KERNEL_OK")
</pallas_src>

<mosaic_0001>
module attributes {stable_mosaic.version = 11 : i64} {
  func.func @_proj_dyt_kernel(%arg0: i32, %arg1: memref<16x4xf32, #tpu.memory_space<vmem>>, %arg2: memref<4x8xbf16, #tpu.memory_space<vmem>>, %arg3: memref<1x8xf32, #tpu.memory_space<vmem>>, %arg4: memref<8x16xbf16, #tpu.memory_space<vmem>>, %arg5: memref<1x16xf32, #tpu.memory_space<vmem>>, %arg6: memref<16x8xbf16, #tpu.memory_space<vmem>>, %arg7: memref<1x8xf32, #tpu.memory_space<vmem>>, %arg8: memref<1x1xf32, #tpu.memory_space<vmem>>, %arg9: memref<1x8xf32, #tpu.memory_space<vmem>>, %arg10: memref<1x8xf32, #tpu.memory_space<vmem>>, %arg11: memref<16x8xbf16, #tpu.memory_space<vmem>>) attributes {dimension_semantics = [#tpu.dimension_semantics<parallel>], iteration_bounds = array<i64: 1>, scalar_prefetch = 0 : i64, scratch_operands = 0 : i64, tpu.core_type = #tpu.core_type<tc>, window_params = [{transform_indices = @transform_0, window_bounds = array<i64: 16, 4>}, {pipeline_mode = #tpu.pipeline_mode<synchronous>, transform_indices = @transform_1, window_bounds = array<i64: 4, 8>}, {pipeline_mode = #tpu.pipeline_mode<synchronous>, transform_indices = @transform_2, window_bounds = array<i64: 1, 8>}, {pipeline_mode = #tpu.pipeline_mode<synchronous>, transform_indices = @transform_3, window_bounds = array<i64: 8, 16>}, {pipeline_mode = #tpu.pipeline_mode<synchronous>, transform_indices = @transform_4, window_bounds = array<i64: 1, 16>}, {pipeline_mode = #tpu.pipeline_mode<synchronous>, transform_indices = @transform_5, window_bounds = array<i64: 16, 8>}, {pipeline_mode = #tpu.pipeline_mode<synchronous>, transform_indices = @transform_6, window_bounds = array<i64: 1, 8>}, {pipeline_mode = #tpu.pipeline_mode<synchronous>, transform_indices = @transform_7, window_bounds = array<i64: 1, 1>}, {pipeline_mode = #tpu.pipeline_mode<synchronous>, transform_indices = @transform_8, window_bounds = array<i64: 1, 8>}, {pipeline_mode = #tpu.pipeline_mode<synchronous>, transform_indices = @transform_9, window_bounds = array<i64: 1, 8>}, {transform_indices = @transform_10, window_bounds = array<i64: 16, 8>}]} {
    %c0 = arith.constant 0 : index
    %c0_0 = arith.constant 0 : index
    %0 = vector.load %arg1[%c0, %c0_0] : memref<16x4xf32, #tpu.memory_space<vmem>>, vector<16x4xf32>
    %1 = arith.truncf %0 : vector<16x4xf32> to vector<16x4xbf16>
    %c0_1 = arith.constant 0 : index
    %c0_2 = arith.constant 0 : index
    %2 = vector.load %arg2[%c0_1, %c0_2] : memref<4x8xbf16, #tpu.memory_space<vmem>>, vector<4x8xbf16>
    %cst = arith.constant dense<0.000000e+00> : vector<16x8xf32>
    %3 = tpu.matmul %1, %2, %cst {dimension_numbers = #tpu.dot_dimension_numbers<[1], [0], [0], [1], [0, 0, 1, 1], [], []>} : vector<16x4xbf16>, vector<4x8xbf16>, vector<16x8xf32> -> vector<16x8xf32>
    %c0_3 = arith.constant 0 : index
    %c0_4 = arith.constant 0 : index
    %4 = vector.load %arg3[%c0_3, %c0_4] : memref<1x8xf32, #tpu.memory_space<vmem>>, vector<1x8xf32>
    %5 = vector.broadcast %4 : vector<1x8xf32> to vector<16x8xf32>
    %6 = arith.addf %3, %5 : vector<16x8xf32>
    %7 = arith.truncf %6 : vector<16x8xf32> to vector<16x8xbf16>
    %c0_5 = arith.constant 0 : index
    %c0_6 = arith.constant 0 : index
    %8 = vector.load %arg4[%c0_5, %c0_6] : memref<8x16xbf16, #tpu.memory_space<vmem>>, vector<8x16xbf16>
    %cst_7 = arith.constant dense<0.000000e+00> : vector<16x16xf32>
    %9 = tpu.matmul %7, %8, %cst_7 {dimension_numbers = #tpu.dot_dimension_numbers<[1], [0], [0], [1], [0, 0, 1, 1], [], []>} : vector<16x8xbf16>, vector<8x16xbf16>, vector<16x16xf32> -> vector<16x16xf32>
    %c0_8 = arith.constant 0 : index
    %c0_9 = arith.constant 0 : index
    %10 = vector.load %arg5[%c0_8, %c0_9] : memref<1x16xf32, #tpu.memory_space<vmem>>, vector<1x16xf32>
    %11 = vector.broadcast %10 : vector<1x16xf32> to vector<16x16xf32>
    %12 = arith.addf %9, %11 : vector<16x16xf32>
    %13 = arith.truncf %12 : vector<16x16xf32> to vector<16x16xbf16>
    %c0_10 = arith.constant 0 : index
    %c0_11 = arith.constant 0 : index
    %14 = vector.load %arg6[%c0_10, %c0_11] : memref<16x8xbf16, #tpu.memory_space<vmem>>, vector<16x8xbf16>
    %cst_12 = arith.constant dense<0.000000e+00> : vector<16x8xf32>
    %15 = tpu.matmul %13, %14, %cst_12 {dimension_numbers = #tpu.dot_dimension_numbers<[1], [0], [0], [1], [0, 0, 1, 1], [], []>} : vector<16x16xbf16>, vector<16x8xbf16>, vector<16x8xf32> -> vector<16x8xf32>
    %c0_13 = arith.constant 0 : index
    %c0_14 = arith.constant 0 : index
    %16 = vector.load %arg7[%c0_13, %c0_14] : memref<1x8xf32, #tpu.memory_space<vmem>>, vector<1x8xf32>
    %17 = vector.broadcast %16 : vector<1x8xf32> to vector<16x8xf32>
    %18 = arith.addf %15, %17 : vector<16x8xf32>
    %c0_15 = arith.constant 0 : index
    %c0_16 = arith.constant 0 : index
    %19 = vector.load %arg9[%c0_15, %c0_16] : memref<1x8xf32, #tpu.memory_space<vmem>>, vector<1x8xf32>
    %c0_17 = arith.constant 0 : index
    %c0_18 = arith.constant 0 : index
    %20 = vector.load %arg8[%c0_17, %c0_18] : memref<1x1xf32, #tpu.memory_space<vmem>>, vector<1x1xf32>
    %21 = vector.broadcast %20 : vector<1x1xf32> to vector<16x8xf32>
    %22 = arith.mulf %21, %18 : vector<16x8xf32>
    %23 = math.tanh %22 : vector<16x8xf32>
    %24 = vector.broadcast %19 : vector<1x8xf32> to vector<16x8xf32>
    %25 = arith.mulf %24, %23 : vector<16x8xf32>
    %c0_19 = arith.constant 0 : index
    %c0_20 = arith.constant 0 : index
    %26 = vector.load %arg10[%c0_19, %c0_20] : memref<1x8xf32, #tpu.memory_space<vmem>>, vector<1x8xf32>
    %27 = vector.broadcast %26 : vector<1x8xf32> to vector<16x8xf32>
    %28 = arith.addf %25, %27 : vector<16x8xf32>
    %29 = arith.truncf %28 : vector<16x8xf32> to vector<16x8xbf16>
    %c0_21 = arith.constant 0 : index
    %c0_22 = arith.constant 0 : index
    %30 = vector.load %arg11[%c0_21, %c0_22] : memref<16x8xbf16, #tpu.memory_space<vmem>>, vector<16x8xbf16>
    tpu.vector_store %arg11[%c0_21, %c0_22], %29 {strides = array<i32>} : memref<16x8xbf16, #tpu.memory_space<vmem>>, vector<16x8xbf16>,
    return
  }
  func.func @transform_0(%arg0: i32) -> (i32, i32) {
    %c0_i32 = arith.constant 0 : i32
    %c0_i32_0 = arith.constant 0 : i32
    return %arg0, %c0_i32 : i32, i32
  }
  func.func @transform_1(%arg0: i32) -> (i32, i32) {
    %c0_i32 = arith.constant 0 : i32
    %c0_i32_0 = arith.constant 0 : i32
    %c0_i32_1 = arith.constant 0 : i32
    return %c0_i32, %c0_i32_0 : i32, i32
  }
  func.func @transform_2(%arg0: i32) -> (i32, i32) {
    %c0_i32 = arith.constant 0 : i32
    %c0_i32_0 = arith.constant 0 : i32
    %c0_i32_1 = arith.constant 0 : i32
    return %c0_i32, %c0_i32_0 : i32, i32
  }
  func.func @transform_3(%arg0: i32) -> (i32, i32) {
    %c0_i32 = arith.constant 0 : i32
    %c0_i32_0 = arith.constant 0 : i32
    %c0_i32_1 = arith.constant 0 : i32
    return %c0_i32, %c0_i32_0 : i32, i32
  }
  func.func @transform_4(%arg0: i32) -> (i32, i32) {
    %c0_i32 = arith.constant 0 : i32
    %c0_i32_0 = arith.constant 0 : i32
    %c0_i32_1 = arith.constant 0 : i32
    return %c0_i32, %c0_i32_0 : i32, i32
  }
  func.func @transform_5(%arg0: i32) -> (i32, i32) {
    %c0_i32 = arith.constant 0 : i32
    %c0_i32_0 = arith.constant 0 : i32
    %c0_i32_1 = arith.constant 0 : i32
    return %c0_i32, %c0_i32_0 : i32, i32
  }
  func.func @transform_6(%arg0: i32) -> (i32, i32) {
    %c0_i32 = arith.constant 0 : i32
    %c0_i32_0 = arith.constant 0 : i32
    %c0_i32_1 = arith.constant 0 : i32
    return %c0_i32, %c0_i32_0 : i32, i32
  }
  func.func @transform_7(%arg0: i32) -> (i32, i32) {
    %c0_i32 = arith.constant 0 : i32
    %c0_i32_0 = arith.constant 0 : i32
    %c0_i32_1 = arith.constant 0 : i32
    return %c0_i32, %c0_i32_0 : i32, i32
  }
  func.func @transform_8(%arg0: i32) -> (i32, i32) {
    %c0_i32 = arith.constant 0 : i32
    %c0_i32_0 = arith.constant 0 : i32
    %c0_i32_1 = arith.constant 0 : i32
    return %c0_i32, %c0_i32_0 : i32, i32
  }
  func.func @transform_9(%arg0: i32) -> (i32, i32) {
    %c0_i32 = arith.constant 0 : i32
    %c0_i32_0 = arith.constant 0 : i32
    %c0_i32_1 = arith.constant 0 : i32
    return %c0_i32, %c0_i32_0 : i32, i32
  }
  func.func @transform_10(%arg0: i32) -> (i32, i32) {
    %c0_i32 = arith.constant 0 : i32
    %c0_i32_0 = arith.constant 0 : i32
    return %arg0, %c0_i32 : i32, i32
  }
}

</mosaic_0001>

<bundles_post_ra>
// kernel: tpu_custom_call.1
= control target key start
LH: loop header
LB: loop body
LE: loop exit
PB: predicated region body
PF: predicated region fallthrough
CT: control target
= control target key end

     0   :  { %vm53_vm0 = vcmask 1041408   ;;  %v311_v0 = vmov 0.0   ;;  %vm312_vm1 = vmmov 0   ;;  %vm49_vm2 = vcmask 31744   ;;  %s408_s1 = inlined_call_operand.vmem [shape: bf16[4,8], index: 1, kind: input, shape index: {}]   ;;  %s409_s0 = inlined_call_operand.vmem [shape: f32[16,4], index: 0, kind: input, shape index: {}]   ;;  %s410_s3 = inlined_call_operand.vmem [shape: bf16[8,16], index: 3, kind: input, shape index: {}]   ;;  %s411_s2 = inlined_call_operand.vmem [shape: f32[1,8], index: 2, kind: input, shape index: {}]   ;;  %s412_s5 = inlined_call_operand.vmem [shape: bf16[16,8], index: 5, kind: input, shape index: {}]   ;;  %s413_s7 = inlined_call_operand.<no memory space> [shape: f32[1,1], index: 7, kind: input, shape index: {}]   ;;  %s414_s4 = inlined_call_operand.vmem [shape: f32[1,16], index: 4, kind: input, shape index: {}]   ;;  %s415_s6 = inlined_call_operand.vmem [shape: f32[1,8], index: 6, kind: input, shape index: {}]   ;;  %s416_s8 = inlined_call_operand.vmem [shape: f32[1,8], index: 8, kind: input, shape index: {}]   ;;  %s417_s9 = inlined_call_operand.vmem [shape: f32[1,8], index: 9, kind: input, shape index: {}]   ;;  %s418_s10 = inlined_call_operand.vmem [shape: bf16[16,8], index: 10, kind: output, shape index: {}]  }
   0x1   :  { %284 = vmatprep.subr.bf16.mxu0 %v311_v0  ;;  %v41_v1 = vld [vmem:[%s408_s1] sm:$0x3]  ;;  %286 = vmatprep.mubr.msk.bf16.mxu0 %vm312_vm1, %v311_v0  ;;  %v39_v3 = vld [vmem:[%s409_s0 + $0x8] sm:$0xff]  ;;  %vm111_vm3 = vcmask 1043456   ;;  %vm107_vm4 = vcmask 64512   ;;  %v313_v17 = vmov 0   ;;  %v15_v18 = vstv %s413_s7 }
   0x2   :  { %v38_v2 = vld [vmem:[%s409_s0] sm:$0xff]  ;;  %v55_v4 = vsel %vm53_vm0, %v41_v1, 0  ;;  %290 = vmatprep.subr.bf16.mxu1 %v311_v0  ;;  %292 = vmatprep.mubr.msk.bf16.mxu1 %vm312_vm1, %v311_v0  ;;  %16 = vst [vmem:[#allocation2] sm:$0x1] %v15_v18  ;;  %vm172_vm5 = vcmask 130048   ;;  %vm257_vm6 = vcmask 60416  }
   0x3   :  { %v40_v5 = vpack.c.bf16 %v39_v3, %v38_v2  ;;  %285 = vmatpush3.bf16.msra.mxu0 %v55_v4  ;;  %v99_v6 = vld [vmem:[%s410_s3] sm:$0xf]  ;;  %305 = vset.pattern.permute.xlu0 %v313_v17 }
   0x4   :  { %296 = vmatprep.subr.bf16.mxu0 %v311_v0  ;;  %v113_v7 = vsel %vm111_vm3, %v99_v6, 0  ;;  %v264_v9 = vld [vmem:[%s411_s2] ss:$0 sm:$0xff] }
   0x5   :  { %291 = vmatpush3.bf16.msra.mxu1 %v113_v7  ;;  %v306_v16 = vld [vmem:[%s412_s5] sm:$0xff]  }
   0x6   :  { %287 = vmatmul.mubr.msk.bf16.vlgmr.msra.gmra.mxu0 %vm49_vm2, %v40_v5  ;;  %v266_v21 = vld [vmem:[%s414_s4] ss:$0 sm:$0xff] }
   0x7   :  { %298 = vmatprep.mubr.msk.bf16.mxu0 %vm312_vm1, %v311_v0  ;;  %297 = vmatpush3.bf16.msra.mxu0 %v306_v16  ;;  %v268_v28 = vld [vmem:[%s415_s6] ss:$0 sm:$0xff] }
   0x8   :  { %v272_v38 = vld [vmem:[%s416_s8] ss:$0 sm:$0xff] }
   0x9   :  { %v271_v19 = vld [vmem:[#allocation2] ss:$0 sm:$0xff] }
   0xa   :  { %225 = vperm.xlu0 %305, %v271_v19   ;;  %v273_v40 = vld [vmem:[%s417_s9] ss:$0 sm:$0xff] }
  0x85   :  { %v226_v30 = vpop.permute.xlu0 %225 }
  0xc6   :  { %v91_v8 = vpop.f32.mrf.mxu0 }
  0xc7   :  { %v92_v12 = vadd.f32 %v264_v9, %v91_v8 }
  0xc8   :  { %v288_v10 = vpop.f32.mrf.mxu0 }
  0xca   :  { %v94_v11 = vpop.f32.mrf.mxu0 }
  0xcb   :  { %v95_v13 = vadd.f32 %v264_v9, %v94_v11 }
  0xcc   :  { %v289_v14 = vpop.f32.mrf.mxu0 }
  0xcd   :  { %v98_v15 = vpack.c.bf16 %v95_v13, %v92_v12 }
  0xcf   :  { %293 = vmatmul.mubr.msk.bf16.vlgmr.msra.gmra.mxu1 %vm107_vm4, %v98_v15 }
 0x18f   :  { %v149_v20 = vpop.f32.mrf.mxu1 }
 0x190   :  { %v150_v24 = vadd.f32 %v266_v21, %v149_v20 }
 0x191   :  { %v294_v22 = vpop.f32.mrf.mxu1 }
 0x193   :  { %v152_v23 = vpop.f32.mrf.mxu1 }
 0x194   :  { %v153_v25 = vadd.f32 %v266_v21, %v152_v23 }
 0x195   :  { %v295_v26 = vpop.f32.mrf.mxu1 }
 0x196   :  { %v156_v27 = vpack.c.bf16 %v153_v25, %v150_v24 }
 0x198   :  { %299 = vmatmul.mubr.msk.bf16.vlgmr.msra.gmra.mxu0 %vm172_vm5, %v156_v27 }
 0x258   :  { %v210_v29 = vpop.f32.mrf.mxu0 }
 0x259   :  { %v211_v31 = vadd.f32 %v268_v28, %v210_v29 }
 0x25a   :  { %v300_v32 = vpop.f32.mrf.mxu0 }
 0x25b   :  { %v228_v33 = vmul.f32 %v226_v30, %v211_v31 }
 0x25c   :  { %v213_v34 = vpop.f32.mrf.mxu0 }
 0x25d   :  { %307 = vtanh.f32 %v228_v33  ;;  %v214_v35 = vadd.f32 %v268_v28, %v213_v34 }
 0x25e   :  { %v301_v36 = vpop.f32.mrf.mxu0 }
 0x25f   :  { %v229_v37 = vmul.f32 %v226_v30, %v214_v35 }
 0x261   :  { %309 = vtanh.f32 %v229_v37 }
 0x26a   :  { %v308_v39 = vpop.eup %307 }
 0x26b   :  { %v238_v41 = vmul.f32 %v308_v39, %v272_v38 }
 0x26d   :  { %v247_v42 = vadd.f32 %v273_v40, %v238_v41 }
 0x26e   :  { %v310_v43 = vpop.eup %309 }
 0x26f   :  { %v276_v44 = vpack.c.bf16 %v247_v42, %v247_v42  ;;  %v239_v45 = vmul.f32 %v310_v43, %v272_v38 }
 0x271   :  { %258 = vst.msk [vmem:[%s418_s10] sm:$0xf] %vm257_vm6, %v276_v44  ;;  %v248_v46 = vadd.f32 %v273_v40, %v239_v45 }
 0x273   :  { %v277_v47 = vpack.c.bf16 %v248_v46, %v248_v46 }
 0x275   :  { %259 = vst.msk [vmem:[%s418_s10 + $0x4] sm:$0xf] %vm257_vm6, %v277_v47 }

</bundles_post_ra>
